<compile_context>
chip_gen: v6e
topology: v6e:2x2x1
jax: 0.10.0
libtpu: 0.0.40
codegen_flags: <defaults>
</compile_context>

<pallas_src>
import functools

import jax
import jax.numpy as jnp
from jax.experimental import pallas as pl
from jax.experimental.pallas import tpu as pltpu


def _cdiv(a: int, b: int) -> int:
    return -(-a // b)


def _round_up(a: int, b: int) -> int:
    return ((a + b - 1) // b) * b


def _pack_dims(in_f: int, out_f: int, lane_width: int = 128):
    """Choose lane-dense packing: `pack` atoms per 128-wide row.

    Returns (pack, in_f_pad, out_f_pad) such that pack * in_f_pad equals (or
    is a multiple of) the 128-lane width and pack * out_f_pad is a multiple
    of 128, so both the input and output last dims are full-lane (no masked
    partial stores).
    """
    if in_f <= lane_width:
        in_f_pad = 1 << max(0, (in_f - 1).bit_length())  # next power of two
        pack = lane_width // in_f_pad
        out_f_pad = _round_up(out_f, in_f_pad)  # -> pack*out_f_pad % 128 == 0
    else:
        in_f_pad = _round_up(in_f, lane_width)
        pack = 1
        out_f_pad = _round_up(out_f, lane_width)
    return pack, in_f_pad, out_f_pad


def _prepare_weight(w, pack, in_f_pad, out_f_pad, param_dtype=None):
    """Pad + block-diagonally replicate W once (hoisted out of the call path)."""
    w = jnp.asarray(w, dtype=param_dtype) if param_dtype is not None else jnp.asarray(w)
    in_f, out_f = w.shape
    if (in_f, out_f) != (in_f_pad, out_f_pad):
        w = jnp.zeros((in_f_pad, out_f_pad), w.dtype).at[:in_f, :out_f].set(w)
    if pack > 1:
        w = jnp.kron(jnp.eye(pack, dtype=w.dtype), w)
    return w


def _choose_tile_rows(rows: int, max_tile_rows: int, align: int) -> int:
    if rows <= max_tile_rows:
        # Whole problem in one block: no forced split (an extra grid step is
        # pure ~0.35 us overhead on single-TC v5e/v6e).
        return _round_up(rows, align)
    grid = _cdiv(rows, max_tile_rows)
    if grid % 2:
        grid += 1  # keep the grid even so v7x's 2 TensorCores stay balanced
    return _round_up(_cdiv(rows, grid), align)


def _atomwise_linear_kernel(x_ref, w_ref, o_ref):
    # One tile of packed atoms: (TILE_ROWS, KIN) @ (KIN, KOUT) -> (TILE_ROWS, KOUT)
    o_ref[...] = jnp.dot(
        x_ref[...], w_ref[...], preferred_element_type=jnp.float32
    ).astype(o_ref.dtype)


@functools.partial(
    jax.jit, static_argnames=("pack", "out_f", "out_dtype", "max_tile_rows")
)
def _atomwise_linear_packed(x, w_big, *, pack, out_f, out_dtype, max_tile_rows=None):
    """y = x @ W per atom, with x packed lane-dense (pack atoms per 128-wide row)."""
    num_atoms, in_f = x.shape
    kin, kout = w_big.shape
    in_f_pad = kin // pack
    out_f_pad = kout // pack
    assert in_f <= in_f_pad, "node feature width exceeds prepared weight width"

    # The weight is tiny; cast it to the activation dtype if needed.  The
    # activations are consumed in whatever dtype they already live in HBM
    # (no wrapper-side cast that would add an HBM pass).
    if w_big.dtype != x.dtype:
        w_big = w_big.astype(x.dtype)

    # Rare path: feature width that does not divide 128 needs x-side padding.
    if in_f != in_f_pad:
        x = jnp.pad(x, ((0, 0), (0, in_f_pad - in_f)))

    # Lane-dense packing: group `pack` consecutive atoms per 128-wide row.
    # Pad at most pack-1 atoms so the (free, row-major) reshape is valid; the
    # tile-level remainder is handled by Pallas' partial last grid block.
    rows = _cdiv(num_atoms, pack)
    atoms_packed = rows * pack
    if atoms_packed != num_atoms:
        x = jnp.pad(x, ((0, atoms_packed - num_atoms), (0, 0)))
    x_packed = x.reshape(rows, kin)

    itemsize = jnp.dtype(x.dtype).itemsize
    align = {4: 8, 2: 16, 1: 32}.get(itemsize, 8)  # match native sublane packing
    if max_tile_rows is None:
        max_tile_rows = 8192 if itemsize <= 2 else 4096
    tile_rows = _choose_tile_rows(rows, max_tile_rows, align)
    grid = _cdiv(rows, tile_rows)

    out_itemsize = jnp.dtype(out_dtype).itemsize
    cost = pl.CostEstimate(
        flops=2 * rows * kin * kout,
        transcendentals=0,
        bytes_accessed=rows * kin * itemsize
        + kin * kout * itemsize
        + rows * kout * out_itemsize,
    )

    y_packed = pl.pallas_call(
        _atomwise_linear_kernel,
        out_shape=jax.ShapeDtypeStruct((rows, kout), out_dtype),
        grid=(grid,),
        in_specs=[
            pl.BlockSpec((tile_rows, kin), lambda i: (i, 0)),
            # Constant index map: the weight block stays resident in VMEM
            # across all grid steps (no per-step re-DMA).
            pl.BlockSpec((kin, kout), lambda i: (0, 0)),
        ],
        out_specs=pl.BlockSpec((tile_rows, kout), lambda i: (i, 0)),
        compiler_params=pltpu.CompilerParams(
            dimension_semantics=("parallel",),
        ),
        cost_estimate=cost,
    )(x_packed, w_big)

    # Undo the packing; the slices below are no-ops in the common case where
    # num_atoms % pack == 0 and out_f divides 128.
    y = y_packed.reshape(atoms_packed, out_f_pad)
    if atoms_packed != num_atoms or out_f_pad != out_f:
        y = y[:num_atoms, :out_f]
    return y


def atomwise_linear(x, w, *, out_dtype=None, max_tile_rows=None):
    """One-off y = x @ w.  Prefer AtomwiseOperationPallas inside a model so
    the weight preprocessing is hoisted out of the per-call path."""
    in_f, out_f = w.shape
    pack, in_f_pad, out_f_pad = _pack_dims(in_f, out_f)
    w_big = _prepare_weight(w, pack, in_f_pad, out_f_pad)
    out_dtype = jnp.dtype(out_dtype if out_dtype is not None else x.dtype)
    return _atomwise_linear_packed(
        x, w_big, pack=pack, out_f=out_f, out_dtype=out_dtype,
        max_tile_rows=max_tile_rows,
    )


class AtomwiseOperationPallas:
    """JAX/Pallas analogue of nequip.nn.AtomwiseOperation.

    `operation` is realized concretely as a scalar-irreps (0e) e3nn-style
    Linear whose per-atom matmul is the Pallas kernel above; `field` selects
    which entry of the data dict the operation is applied to, matching the
    PyTorch module's forward semantics.  All weight preprocessing (padding,
    block-diagonal replication, dtype cast) happens once in __init__.
    """

    # TODO(synk): general (non-scalar, L>0) e3nn irreps operations are not
    # translated here; only the scalar (0e) Linear path is implemented.

    def __init__(self, weight, field: str, param_dtype=None, out_dtype=None):
        weight = jnp.asarray(weight)
        self.in_f, self.out_f = weight.shape
        self.field = field
        self.out_dtype = out_dtype
        self.pack, in_f_pad, out_f_pad = _pack_dims(self.in_f, self.out_f)
        self.w_big = _prepare_weight(weight, self.pack, in_f_pad, out_f_pad, param_dtype)

    def __call__(self, data: dict) -> dict:
        data = dict(data)  # do not mutate the caller's dict
        x = data[self.field]
        assert x.shape[-1] == self.in_f, "node feature width mismatch"
        out_dtype = jnp.dtype(self.out_dtype if self.out_dtype is not None else x.dtype)
        data[self.field] = _atomwise_linear_packed(
            x, self.w_big, pack=self.pack, out_f=self.out_f,
            out_dtype=out_dtype, max_tile_rows=None,
        )
        return data


if __name__ == "__main__":
    key = jax.random.PRNGKey(0)
    k_x, k_w, k_pos = jax.random.split(key, 3)

    NUM_ATOMS = 256      # small synthetic graph
    IN_FEAT = 32         # "32x0e" input irreps
    OUT_FEAT = 32        # "32x0e" output irreps

    # e3nn Linear: standard-normal weights with 1/sqrt(fan_in) path
    # normalization folded into the weight.
    w_raw = jax.random.normal(k_w, (IN_FEAT, OUT_FEAT), dtype=jnp.float32)
    w = w_raw / jnp.sqrt(jnp.float32(IN_FEAT))

    node_features = jax.random.normal(k_x, (NUM_ATOMS, IN_FEAT), dtype=jnp.float32)
    data = {
        "node_features": node_features,
        "pos": jax.random.normal(k_pos, (NUM_ATOMS, 3), dtype=jnp.float32),
    }

    y_ref = node_features @ w

    # f32 path (tight tolerance); other dict fields untouched.
    module = AtomwiseOperationPallas(weight=w, field="node_features")
    out = module(data)
    y = jax.block_until_ready(out["node_features"])
    assert y.shape == (NUM_ATOMS, OUT_FEAT)
    assert jnp.allclose(y, y_ref, atol=1e-5, rtol=1e-5)
    assert out["pos"].shape == data["pos"].shape

    # Ragged atom count (not a multiple of pack) — exercises the pack padding
    # and the partial last grid block.
    n_ragged = 250
    y_rag = jax.block_until_ready(atomwise_linear(node_features[:n_ragged], w))
    assert y_rag.shape == (n_ragged, OUT_FEAT)
    assert jnp.allclose(y_rag, y_ref[:n_ragged], atol=1e-5, rtol=1e-5)

    # bf16 end-to-end: activations already live as bf16, bf16 weight storage,
    # bf16 output; the MXU still accumulates in f32.  Loose tolerance vs. the
    # f32 reference.
    x_bf16 = node_features.astype(jnp.bfloat16)
    module_bf16 = AtomwiseOperationPallas(
        weight=w, field="node_features", param_dtype=jnp.bfloat16
    )
    out_bf16 = module_bf16({"node_features": x_bf16})
    y_bf16 = jax.block_until_ready(out_bf16["node_features"])
    assert y_bf16.dtype == jnp.bfloat16
    assert jnp.allclose(y_bf16.astype(jnp.float32), y_ref, atol=5e-2, rtol=5e-2)

    print("KERNEL_OK")
</pallas_src>

<mosaic_0001>
module attributes {stable_mosaic.version = 11 : i64} {
  func.func @_atomwise_linear_kernel(%arg0: i32, %arg1: memref<64x128xf32, #tpu.memory_space<vmem>>, %arg2: memref<128x128xf32, #tpu.memory_space<vmem>>, %arg3: memref<64x128xf32, #tpu.memory_space<vmem>>) attributes {dimension_semantics = [#tpu.dimension_semantics<parallel>], iteration_bounds = array<i64: 1>, scalar_prefetch = 0 : i64, scratch_operands = 0 : i64, tpu.core_type = #tpu.core_type<tc>, window_params = [{transform_indices = @transform_0, window_bounds = array<i64: 64, 128>}, {pipeline_mode = #tpu.pipeline_mode<synchronous>, transform_indices = @transform_1, window_bounds = array<i64: 128, 128>}, {transform_indices = @transform_2, window_bounds = array<i64: 64, 128>}]} {
    %c0 = arith.constant 0 : index
    %c0_0 = arith.constant 0 : index
    %0 = vector.load %arg1[%c0, %c0_0] : memref<64x128xf32, #tpu.memory_space<vmem>>, vector<64x128xf32>
    %c0_1 = arith.constant 0 : index
    %c0_2 = arith.constant 0 : index
    %1 = vector.load %arg2[%c0_1, %c0_2] : memref<128x128xf32, #tpu.memory_space<vmem>>, vector<128x128xf32>
    %cst = arith.constant dense<0.000000e+00> : vector<64x128xf32>
    %2 = tpu.matmul %0, %1, %cst {dimension_numbers = #tpu.dot_dimension_numbers<[1], [0], [0], [1], [0, 0, 1, 1], [], []>} : vector<64x128xf32>, vector<128x128xf32>, vector<64x128xf32> -> vector<64x128xf32>
    %c0_3 = arith.constant 0 : index
    %c0_4 = arith.constant 0 : index
    %3 = vector.load %arg3[%c0_3, %c0_4] : memref<64x128xf32, #tpu.memory_space<vmem>>, vector<64x128xf32>
    tpu.vector_store %arg3[%c0_3, %c0_4], %2 {strides = array<i32>} : memref<64x128xf32, #tpu.memory_space<vmem>>, vector<64x128xf32>,
    return
  }
  func.func @transform_0(%arg0: i32) -> (i32, i32) {
    %c0_i32 = arith.constant 0 : i32
    %c0_i32_0 = arith.constant 0 : i32
    return %arg0, %c0_i32 : i32, i32
  }
  func.func @transform_1(%arg0: i32) -> (i32, i32) {
    %c0_i32 = arith.constant 0 : i32
    %c0_i32_0 = arith.constant 0 : i32
    %c0_i32_1 = arith.constant 0 : i32
    return %c0_i32, %c0_i32_0 : i32, i32
  }
  func.func @transform_2(%arg0: i32) -> (i32, i32) {
    %c0_i32 = arith.constant 0 : i32
    %c0_i32_0 = arith.constant 0 : i32
    return %arg0, %c0_i32 : i32, i32
  }
}

</mosaic_0001>

<bundles_post_ra>
// kernel: _atomwise_linear_packed.1
= control target key start
LH: loop header
LB: loop body
LE: loop exit
PB: predicated region body
PF: predicated region fallthrough
CT: control target
= control target key end

     0   :  { %s363_s1 = inlined_call_operand.vmem [shape: f32[128,128], index: 1, kind: input, shape index: {}]   ;;  %s364_s0 = inlined_call_operand.vmem [shape: f32[64,128], index: 0, kind: input, shape index: {}]   ;;  %s365_s2 = inlined_call_operand.vmem [shape: f32[64,128], index: 2, kind: output, shape index: {}]  }
   0x1   :  { %v34_v0 = vld [vmem:[%s363_s1 + $0x78] sm:$0xff]  ;;  %v33_v1 = vld [vmem:[%s363_s1 + $0x70] sm:$0xff]  ;;  %v32_v2 = vld [vmem:[%s363_s1 + $0x68] sm:$0xff] }
   0x2   :  { %176 = vmatprep.subr.mxu0 %v34_v0  ;;  %220 = vmatprep.subr.mxu1 %v34_v0  ;;  %v31_v3 = vld [vmem:[%s363_s1 + $0x60] sm:$0xff]  ;;  %v30_v4 = vld [vmem:[%s363_s1 + $0x58] sm:$0xff]  ;;  %v29_v5 = vld [vmem:[%s363_s1 + $0x50] sm:$0xff] }
   0x3   :  { %177 = vmatpush3.msra.mxu0 %v34_v0  ;;  %236 = vmatpush3.msra.mxu1 %v34_v0  ;;  %v28_v6 = vld [vmem:[%s363_s1 + $0x48] sm:$0xff]  ;;  %v27_v7 = vld [vmem:[%s363_s1 + $0x40] sm:$0xff]  ;;  %v26_v8 = vld [vmem:[%s363_s1 + $0x38] sm:$0xff] }
   0x4   :  { %178 = vmatprep.subr.mxu0 %v33_v1  ;;  %221 = vmatprep.subr.mxu1 %v33_v1  ;;  %v25_v9 = vld [vmem:[%s363_s1 + $0x30] sm:$0xff]  ;;  %v24_v10 = vld [vmem:[%s363_s1 + $0x28] sm:$0xff]  ;;  %v23_v11 = vld [vmem:[%s363_s1 + $0x20] sm:$0xff] }
   0x5   :  { %179 = vmatpush3.msra.mxu0 %v33_v1  ;;  %237 = vmatpush3.msra.mxu1 %v33_v1  ;;  %v22_v12 = vld [vmem:[%s363_s1 + $0x18] sm:$0xff]  ;;  %v21_v13 = vld [vmem:[%s363_s1 + $0x10] sm:$0xff]  ;;  %v20_v14 = vld [vmem:[%s363_s1 + $0x8] sm:$0xff] }
   0x6   :  { %180 = vmatprep.subr.mxu0 %v32_v2  ;;  %222 = vmatprep.subr.mxu1 %v32_v2  ;;  %v19_v15 = vld [vmem:[%s363_s1] sm:$0xff]  ;;  %v12_v18 = vld [vmem:[%s364_s0 + $0x8] sm:$0xff]  ;;  %v13_v20 = vld [vmem:[%s364_s0 + $0x10] sm:$0xff] }
   0x7   :  { %181 = vmatpush3.msra.mxu0 %v32_v2  ;;  %238 = vmatpush3.msra.mxu1 %v32_v2  ;;  %v11_v16 = vld [vmem:[%s364_s0] sm:$0xff]  ;;  %v16_v19 = vld [vmem:[%s364_s0 + $0x28] sm:$0xff]  ;;  %v17_v21 = vld [vmem:[%s364_s0 + $0x30] sm:$0xff] }
   0x8   :  { %182 = vmatprep.subr.mxu0 %v31_v3  ;;  %223 = vmatprep.subr.mxu1 %v31_v3  ;;  %v15_v17 = vld [vmem:[%s364_s0 + $0x20] sm:$0xff]  ;;  %v14_v22 = vld [vmem:[%s364_s0 + $0x18] sm:$0xff] }
   0x9   :  { %183 = vmatpush3.msra.mxu0 %v31_v3  ;;  %239 = vmatpush3.msra.mxu1 %v31_v3  ;;  %v18_v23 = vld [vmem:[%s364_s0 + $0x38] sm:$0xff] }
   0xa   :  { %184 = vmatprep.subr.mxu0 %v30_v4  ;;  %224 = vmatprep.subr.mxu1 %v30_v4 }
   0xb   :  { %185 = vmatpush3.msra.mxu0 %v30_v4  ;;  %240 = vmatpush3.msra.mxu1 %v30_v4 }
   0xc   :  { %186 = vmatprep.subr.mxu0 %v29_v5  ;;  %225 = vmatprep.subr.mxu1 %v29_v5 }
   0xd   :  { %187 = vmatpush3.msra.mxu0 %v29_v5  ;;  %241 = vmatpush3.msra.mxu1 %v29_v5 }
   0xe   :  { %188 = vmatprep.subr.mxu0 %v28_v6  ;;  %226 = vmatprep.subr.mxu1 %v28_v6 }
   0xf   :  { %189 = vmatpush3.msra.mxu0 %v28_v6  ;;  %242 = vmatpush3.msra.mxu1 %v28_v6 }
  0x10   :  { %190 = vmatprep.subr.mxu0 %v27_v7  ;;  %227 = vmatprep.subr.mxu1 %v27_v7 }
  0x11   :  { %191 = vmatpush3.msra.mxu0 %v27_v7  ;;  %243 = vmatpush3.msra.mxu1 %v27_v7 }
  0x12   :  { %192 = vmatprep.subr.mxu0 %v26_v8  ;;  %228 = vmatprep.subr.mxu1 %v26_v8 }
  0x13   :  { %193 = vmatpush3.msra.mxu0 %v26_v8  ;;  %244 = vmatpush3.msra.mxu1 %v26_v8 }
  0x14   :  { %194 = vmatprep.subr.mxu0 %v25_v9  ;;  %229 = vmatprep.subr.mxu1 %v25_v9 }
  0x15   :  { %195 = vmatpush3.msra.mxu0 %v25_v9  ;;  %245 = vmatpush3.msra.mxu1 %v25_v9 }
  0x16   :  { %196 = vmatprep.subr.mxu0 %v24_v10  ;;  %230 = vmatprep.subr.mxu1 %v24_v10 }
  0x17   :  { %197 = vmatpush3.msra.mxu0 %v24_v10  ;;  %246 = vmatpush3.msra.mxu1 %v24_v10 }
  0x18   :  { %198 = vmatprep.subr.mxu0 %v23_v11  ;;  %231 = vmatprep.subr.mxu1 %v23_v11 }
  0x19   :  { %199 = vmatpush3.msra.mxu0 %v23_v11  ;;  %247 = vmatpush3.msra.mxu1 %v23_v11 }
  0x1a   :  { %200 = vmatprep.subr.mxu0 %v22_v12  ;;  %232 = vmatprep.subr.mxu1 %v22_v12 }
  0x1b   :  { %201 = vmatpush3.msra.mxu0 %v22_v12  ;;  %248 = vmatpush3.msra.mxu1 %v22_v12 }
  0x1c   :  { %202 = vmatprep.subr.mxu0 %v21_v13  ;;  %233 = vmatprep.subr.mxu1 %v21_v13 }
  0x1d   :  { %203 = vmatpush3.msra.mxu0 %v21_v13  ;;  %249 = vmatpush3.msra.mxu1 %v21_v13 }
  0x1e   :  { %204 = vmatprep.subr.mxu0 %v20_v14  ;;  %234 = vmatprep.subr.mxu1 %v20_v14 }
  0x1f   :  { %205 = vmatpush3.msra.mxu0 %v20_v14  ;;  %250 = vmatpush3.msra.mxu1 %v20_v14 }
  0x20   :  { %206 = vmatprep.subr.mxu0 %v19_v15  ;;  %235 = vmatprep.subr.mxu1 %v19_v15 }
  0x21   :  { %207 = vmatpush3.msra.mxu0 %v19_v15  ;;  %251 = vmatpush3.msra.mxu1 %v19_v15 }
  0x22   :  { %208 = vmatprep.mubr.f32.mxu0 %v11_v16  ;;  %214 = vmatprep.mubr.f32.mxu1 %v15_v17 }
  0x23   :  { %209 = vmatmul.mubr.f32.vlgmr.msra.gmra.mxu0 %v12_v18  ;;  %215 = vmatmul.mubr.f32.vlgmr.msra.gmra.mxu1 %v16_v19 }
  0x24   :  { %211 = vmatprep.mubr.f32.mxu0 %v13_v20  ;;  %217 = vmatprep.mubr.f32.mxu1 %v17_v21 }
  0x27   :  { %212 = vmatmul.mubr.f32.gmra.mxu0 %v14_v22  ;;  %218 = vmatmul.mubr.f32.gmra.mxu1 %v18_v23 }
  0xe3   :  { %v210_v24 = vpop.f32.mrf.mxu0  ;;  %v216_v25 = vpop.f32.mrf.mxu1 }
  0xe4   :  { %141 = vst [vmem:[%s365_s2 + $0x8] sm:$0xff] %v210_v24  ;;  %145 = vst [vmem:[%s365_s2 + $0x28] sm:$0xff] %v216_v25 }
  0xe5   :  { %v101_v26 = vpop.f32.mrf.mxu0  ;;  %v121_v27 = vpop.f32.mrf.mxu1 }
  0xe6   :  { %140 = vst [vmem:[%s365_s2] sm:$0xff] %v101_v26  ;;  %144 = vst [vmem:[%s365_s2 + $0x20] sm:$0xff] %v121_v27 }
  0xe7   :  { %v213_v28 = vpop.f32.mrf.mxu0  ;;  %v219_v29 = vpop.f32.mrf.mxu1 }
  0xe8   :  { %143 = vst [vmem:[%s365_s2 + $0x18] sm:$0xff] %v213_v28  ;;  %147 = vst [vmem:[%s365_s2 + $0x38] sm:$0xff] %v219_v29 }
  0xe9   :  { %v111_v30 = vpop.f32.mrf.mxu0  ;;  %v131_v31 = vpop.f32.mrf.mxu1 }
  0xea   :  { %142 = vst [vmem:[%s365_s2 + $0x10] sm:$0xff] %v111_v30  ;;  %146 = vst [vmem:[%s365_s2 + $0x30] sm:$0xff] %v131_v31 }

</bundles_post_ra>
